<compile_context>
chip_gen: v5e
topology: v5e:2x2
jax: 0.10.0
libtpu: 0.0.40
codegen_flags: <defaults>
</compile_context>

<pallas_src>
import functools

import jax
import jax.numpy as jnp
from jax.experimental import pallas as pl
from jax.experimental.pallas import tpu as pltpu


# ----------------------------- Pallas kernel ---------------------------------
def _gnn_kernel(num_layers, x_ref, a_ref, wn_ref, bn_ref, wl_ref, bl_ref, p_ref, o_ref):
    # Load A and the biases once (hoisted out of the layer loop).
    a = a_ref[...]                 # [Np, Np]   bf16, reused by every layer
    b_node = bn_ref[...]           # [1, Hp]    f32
    b_layers = bl_ref[...]         # [L, 1, Hp] f32

    # Node embedding: h = x @ W_node + b_node                       -> [Np, Hp]
    h32 = jnp.dot(x_ref[...], wn_ref[...], preferred_element_type=jnp.float32) + b_node
    h = h32.astype(jnp.bfloat16)

    # GCN layers: h <- ReLU( A_norm @ (h @ W_l) + b_l )
    # (matches PyG GCNConv: lin -> propagate -> +bias). Static unroll; num_layers is small
    # (L=3, H=128 -> no vreg-pressure concern; switch to lax.fori_loop(unroll=True) if L grows).
    for l in range(num_layers):
        hw = jnp.dot(h, wl_ref[l], preferred_element_type=jnp.float32).astype(jnp.bfloat16)
        h32 = jnp.dot(a, hw, preferred_element_type=jnp.float32) + b_layers[l]
        h = jnp.maximum(h32, 0.0).astype(jnp.bfloat16)

    # global_mean_pool: out = P @ h                                  -> [Gp, Hp] (f32)
    o_ref[...] = jnp.dot(p_ref[...], h, preferred_element_type=jnp.float32)


# ------------------------------ wrapper ---------------------------------------
def _round_up(v, m):
    return (v + m - 1) // m * m


def _pad_to(a, shape):
    return jnp.pad(a, [(0, t - s) for s, t in zip(a.shape, shape)])


def feature_extractor_gnn_pallas(x, a_norm, w_node, b_node, w_layers, b_layers, pool):
    n, in_dim = x.shape
    num_layers, hidden, _ = w_layers.shape
    num_graphs = pool.shape[0]

    # Pad lane dims to 128 and the pooled-graph (sublane) dim to 16 so all operands and the
    # output are (8,128)-tile aligned. Zero padding is exact: padded rows/cols never couple to
    # real nodes (A_norm / pool columns for padded nodes are zero) and are sliced off afterwards.
    n_p = _round_up(n, 128)
    in_p = _round_up(in_dim, 128)
    h_p = _round_up(hidden, 128)
    g_p = _round_up(num_graphs, 16)

    # bf16 matmul operands (MXU-native on v5e/v6e/v7x), f32 biases added after f32 accumulation.
    x_p = _pad_to(x, (n_p, in_p)).astype(jnp.bfloat16)
    a_p = _pad_to(a_norm, (n_p, n_p)).astype(jnp.bfloat16)
    wn_p = _pad_to(w_node, (in_p, h_p)).astype(jnp.bfloat16)
    bn_p = _pad_to(b_node, (1, h_p)).astype(jnp.float32)
    wl_p = _pad_to(w_layers, (num_layers, h_p, h_p)).astype(jnp.bfloat16)
    bl_p = _pad_to(b_layers, (num_layers, 1, h_p)).astype(jnp.float32)
    pool_p = _pad_to(pool, (g_p, n_p)).astype(jnp.bfloat16)

    flops = (
        2 * n_p * in_p * h_p
        + num_layers * (2 * n_p * h_p * h_p + 2 * n_p * n_p * h_p)
        + 2 * g_p * n_p * h_p
    )
    bytes_accessed = sum(
        int(arr.size) * arr.dtype.itemsize
        for arr in (x_p, a_p, wn_p, bn_p, wl_p, bl_p, pool_p)
    ) + g_p * h_p * 4

    vmem = pl.BlockSpec(memory_space=pltpu.MemorySpace.VMEM)  # whole (padded) problem fits VMEM
    out_p = pl.pallas_call(
        functools.partial(_gnn_kernel, num_layers),
        out_shape=jax.ShapeDtypeStruct((g_p, h_p), jnp.float32),
        in_specs=[vmem] * 7,
        out_specs=vmem,
        compiler_params=pltpu.CompilerParams(vmem_limit_bytes=64 << 20),
        cost_estimate=pl.CostEstimate(
            flops=flops, transcendentals=0, bytes_accessed=bytes_accessed
        ),
    )(x_p, a_p, wn_p, bn_p, wl_p, bl_p, pool_p)

    return out_p[:num_graphs, :hidden]


# ------------------------------ JAX glue --------------------------------------
def build_gcn_norm_adj(edge_index, num_nodes):
    """Dense D^-1/2 (A + I) D^-1/2 with messages flowing source(row) -> target(col)."""
    row, col = edge_index[0], edge_index[1]
    loop = jnp.arange(num_nodes, dtype=edge_index.dtype)
    row = jnp.concatenate([row, loop])
    col = jnp.concatenate([col, loop])
    w = jnp.ones(row.shape[0], jnp.float32)
    deg = jnp.zeros(num_nodes, jnp.float32).at[col].add(w)
    dinv = jnp.where(deg > 0, 1.0 / jnp.sqrt(deg), 0.0)
    norm = dinv[row] * w * dinv[col]
    # out[target] += norm * x[source]  =>  A[target, source] += norm
    return jnp.zeros((num_nodes, num_nodes), jnp.float32).at[col, row].add(norm)


def build_mean_pool(batch, num_graphs, num_nodes):
    counts = jnp.zeros(num_graphs, jnp.float32).at[batch].add(1.0)
    onehot = jnp.zeros((num_graphs, num_nodes), jnp.float32).at[
        batch, jnp.arange(num_nodes)
    ].set(1.0)
    return onehot / jnp.maximum(counts, 1.0)[:, None]


def reference_forward(x, a_norm, w_node, b_node, w_layers, b_layers, pool):
    h = x @ w_node + b_node
    for l in range(w_layers.shape[0]):
        h = a_norm @ (h @ w_layers[l]) + b_layers[l]
        h = jnp.maximum(h, 0.0)
    return pool @ h


# ------------------------------- main ------------------------------------------
if __name__ == "__main__":
    # Small, deterministic problem:
    num_nodes = 16
    node_in_dim = 8
    edge_in_dim = 4   # unused for 'gcn' (edge_attr ignored), kept for interface fidelity
    hidden_dim = 32
    num_layers = 3
    num_graphs = 2
    num_edges = 24

    key = jax.random.PRNGKey(0)
    k_x, k_e, k_ea, k_wn, k_bn, k_wl, k_bl = jax.random.split(key, 7)

    # Inputs (mirror the PyTorch forward signature)
    x = jax.random.normal(k_x, (num_nodes, node_in_dim), jnp.float32)
    edge_index = jax.random.randint(k_e, (2, num_edges), 0, num_nodes, jnp.int32)
    edge_attr = jax.random.normal(k_ea, (num_edges, edge_in_dim), jnp.float32)  # ignored by gcn
    batch = jnp.concatenate(
        [jnp.zeros(num_nodes // 2, jnp.int32), jnp.ones(num_nodes - num_nodes // 2, jnp.int32)]
    )

    # Deterministic parameter init (shapes follow the module's __init__)
    w_node = jax.random.normal(k_wn, (node_in_dim, hidden_dim), jnp.float32) * 0.1
    b_node = jax.random.normal(k_bn, (1, hidden_dim), jnp.float32) * 0.1
    w_layers = jax.random.normal(k_wl, (num_layers, hidden_dim, hidden_dim), jnp.float32) * 0.1
    b_layers = jax.random.normal(k_bl, (num_layers, 1, hidden_dim), jnp.float32) * 0.1

    # Densify graph structure (glue, plain JAX)
    a_norm = build_gcn_norm_adj(edge_index, num_nodes)
    pool = build_mean_pool(batch, num_graphs, num_nodes)

    out = feature_extractor_gnn_pallas(x, a_norm, w_node, b_node, w_layers, b_layers, pool)
    out = jax.block_until_ready(out)

    ref = reference_forward(x, a_norm, w_node, b_node, w_layers, b_layers, pool)
    assert out.shape == (num_graphs, hidden_dim)
    # bf16 MXU inputs with f32 accumulation -> loosened tolerance vs. the f32 reference.
    assert jnp.allclose(out, ref, rtol=2e-2, atol=2e-2), "Pallas output mismatch vs JAX reference"

    print("KERNEL_OK")
</pallas_src>

<mosaic_0001>
module attributes {stable_mosaic.version = 11 : i64} {
  func.func @_gnn_kernel(%arg0: memref<128x128xbf16, #tpu.memory_space<vmem>>, %arg1: memref<128x128xbf16, #tpu.memory_space<vmem>>, %arg2: memref<128x128xbf16, #tpu.memory_space<vmem>>, %arg3: memref<1x128xf32, #tpu.memory_space<vmem>>, %arg4: memref<3x128x128xbf16, #tpu.memory_space<vmem>>, %arg5: memref<3x1x128xf32, #tpu.memory_space<vmem>>, %arg6: memref<16x128xbf16, #tpu.memory_space<vmem>>, %arg7: memref<16x128xf32, #tpu.memory_space<vmem>>) attributes {dimension_semantics = [], scalar_prefetch = 0 : i64, scratch_operands = 0 : i64, tpu.core_type = #tpu.core_type<tc>} {
    %c0 = arith.constant 0 : index
    %c0_0 = arith.constant 0 : index
    %0 = vector.load %arg1[%c0, %c0_0] : memref<128x128xbf16, #tpu.memory_space<vmem>>, vector<128x128xbf16>
    %c0_1 = arith.constant 0 : index
    %c0_2 = arith.constant 0 : index
    %1 = vector.load %arg3[%c0_1, %c0_2] : memref<1x128xf32, #tpu.memory_space<vmem>>, vector<1x128xf32>
    %c0_3 = arith.constant 0 : index
    %c0_4 = arith.constant 0 : index
    %c0_5 = arith.constant 0 : index
    %2 = vector.load %arg5[%c0_3, %c0_4, %c0_5] : memref<3x1x128xf32, #tpu.memory_space<vmem>>, vector<3x1x128xf32>
    %c0_6 = arith.constant 0 : index
    %c0_7 = arith.constant 0 : index
    %3 = vector.load %arg0[%c0_6, %c0_7] : memref<128x128xbf16, #tpu.memory_space<vmem>>, vector<128x128xbf16>
    %c0_8 = arith.constant 0 : index
    %c0_9 = arith.constant 0 : index
    %4 = vector.load %arg2[%c0_8, %c0_9] : memref<128x128xbf16, #tpu.memory_space<vmem>>, vector<128x128xbf16>
    %cst = arith.constant dense<0.000000e+00> : vector<128x128xf32>
    %5 = tpu.matmul %3, %4, %cst {dimension_numbers = #tpu.dot_dimension_numbers<[1], [0], [0], [1], [0, 0, 1, 1], [], []>} : vector<128x128xbf16>, vector<128x128xbf16>, vector<128x128xf32> -> vector<128x128xf32>
    %6 = vector.broadcast %1 : vector<1x128xf32> to vector<128x128xf32>
    %7 = arith.addf %5, %6 : vector<128x128xf32>
    %8 = arith.truncf %7 : vector<128x128xf32> to vector<128x128xbf16>
    %c0_10 = arith.constant 0 : index
    %c0_11 = arith.constant 0 : index
    %c0_12 = arith.constant 0 : index
    %9 = vector.load %arg4[%c0_10, %c0_11, %c0_12] : memref<3x128x128xbf16, #tpu.memory_space<vmem>>, vector<1x128x128xbf16>
    %10 = vector.shape_cast %9 : vector<1x128x128xbf16> to vector<128x128xbf16>
    %cst_13 = arith.constant dense<0.000000e+00> : vector<128x128xf32>
    %11 = tpu.matmul %8, %10, %cst_13 {dimension_numbers = #tpu.dot_dimension_numbers<[1], [0], [0], [1], [0, 0, 1, 1], [], []>} : vector<128x128xbf16>, vector<128x128xbf16>, vector<128x128xf32> -> vector<128x128xf32>
    %12 = arith.truncf %11 : vector<128x128xf32> to vector<128x128xbf16>
    %cst_14 = arith.constant dense<0.000000e+00> : vector<128x128xf32>
    %13 = tpu.matmul %0, %12, %cst_14 {dimension_numbers = #tpu.dot_dimension_numbers<[1], [0], [0], [1], [0, 0, 1, 1], [], []>} : vector<128x128xbf16>, vector<128x128xbf16>, vector<128x128xf32> -> vector<128x128xf32>
    %14 = vector.extract_strided_slice %2 {offsets = [0, 0, 0], sizes = [1, 1, 128], strides = [1, 1, 1]} : vector<3x1x128xf32> to vector<1x1x128xf32>
    %15 = vector.shape_cast %14 : vector<1x1x128xf32> to vector<1x128xf32>
    %16 = vector.broadcast %15 : vector<1x128xf32> to vector<128x128xf32>
    %17 = arith.addf %13, %16 : vector<128x128xf32>
    %cst_15 = arith.constant 0.000000e+00 : f32
    %18 = vector.broadcast %cst_15 : f32 to vector<128x128xf32>
    %19 = arith.maximumf %17, %18 : vector<128x128xf32>
    %20 = arith.truncf %19 : vector<128x128xf32> to vector<128x128xbf16>
    %c1 = arith.constant 1 : index
    %c0_16 = arith.constant 0 : index
    %c0_17 = arith.constant 0 : index
    %21 = vector.load %arg4[%c1, %c0_16, %c0_17] : memref<3x128x128xbf16, #tpu.memory_space<vmem>>, vector<1x128x128xbf16>
    %22 = vector.shape_cast %21 : vector<1x128x128xbf16> to vector<128x128xbf16>
    %cst_18 = arith.constant dense<0.000000e+00> : vector<128x128xf32>
    %23 = tpu.matmul %20, %22, %cst_18 {dimension_numbers = #tpu.dot_dimension_numbers<[1], [0], [0], [1], [0, 0, 1, 1], [], []>} : vector<128x128xbf16>, vector<128x128xbf16>, vector<128x128xf32> -> vector<128x128xf32>
    %24 = arith.truncf %23 : vector<128x128xf32> to vector<128x128xbf16>
    %cst_19 = arith.constant dense<0.000000e+00> : vector<128x128xf32>
    %25 = tpu.matmul %0, %24, %cst_19 {dimension_numbers = #tpu.dot_dimension_numbers<[1], [0], [0], [1], [0, 0, 1, 1], [], []>} : vector<128x128xbf16>, vector<128x128xbf16>, vector<128x128xf32> -> vector<128x128xf32>
    %26 = vector.extract_strided_slice %2 {offsets = [1, 0, 0], sizes = [1, 1, 128], strides = [1, 1, 1]} : vector<3x1x128xf32> to vector<1x1x128xf32>
    %27 = vector.shape_cast %26 : vector<1x1x128xf32> to vector<1x128xf32>
    %28 = vector.broadcast %27 : vector<1x128xf32> to vector<128x128xf32>
    %29 = arith.addf %25, %28 : vector<128x128xf32>
    %cst_20 = arith.constant 0.000000e+00 : f32
    %30 = vector.broadcast %cst_20 : f32 to vector<128x128xf32>
    %31 = arith.maximumf %29, %30 : vector<128x128xf32>
    %32 = arith.truncf %31 : vector<128x128xf32> to vector<128x128xbf16>
    %c2 = arith.constant 2 : index
    %c0_21 = arith.constant 0 : index
    %c0_22 = arith.constant 0 : index
    %33 = vector.load %arg4[%c2, %c0_21, %c0_22] : memref<3x128x128xbf16, #tpu.memory_space<vmem>>, vector<1x128x128xbf16>
    %34 = vector.shape_cast %33 : vector<1x128x128xbf16> to vector<128x128xbf16>
    %cst_23 = arith.constant dense<0.000000e+00> : vector<128x128xf32>
    %35 = tpu.matmul %32, %34, %cst_23 {dimension_numbers = #tpu.dot_dimension_numbers<[1], [0], [0], [1], [0, 0, 1, 1], [], []>} : vector<128x128xbf16>, vector<128x128xbf16>, vector<128x128xf32> -> vector<128x128xf32>
    %36 = arith.truncf %35 : vector<128x128xf32> to vector<128x128xbf16>
    %cst_24 = arith.constant dense<0.000000e+00> : vector<128x128xf32>
    %37 = tpu.matmul %0, %36, %cst_24 {dimension_numbers = #tpu.dot_dimension_numbers<[1], [0], [0], [1], [0, 0, 1, 1], [], []>} : vector<128x128xbf16>, vector<128x128xbf16>, vector<128x128xf32> -> vector<128x128xf32>
    %38 = vector.extract_strided_slice %2 {offsets = [2, 0, 0], sizes = [1, 1, 128], strides = [1, 1, 1]} : vector<3x1x128xf32> to vector<1x1x128xf32>
    %39 = vector.shape_cast %38 : vector<1x1x128xf32> to vector<1x128xf32>
    %40 = vector.broadcast %39 : vector<1x128xf32> to vector<128x128xf32>
    %41 = arith.addf %37, %40 : vector<128x128xf32>
    %cst_25 = arith.constant 0.000000e+00 : f32
    %42 = vector.broadcast %cst_25 : f32 to vector<128x128xf32>
    %43 = arith.maximumf %41, %42 : vector<128x128xf32>
    %44 = arith.truncf %43 : vector<128x128xf32> to vector<128x128xbf16>
    %c0_26 = arith.constant 0 : index
    %c0_27 = arith.constant 0 : index
    %45 = vector.load %arg6[%c0_26, %c0_27] : memref<16x128xbf16, #tpu.memory_space<vmem>>, vector<16x128xbf16>
    %cst_28 = arith.constant dense<0.000000e+00> : vector<16x128xf32>
    %46 = tpu.matmul %45, %44, %cst_28 {dimension_numbers = #tpu.dot_dimension_numbers<[1], [0], [0], [1], [0, 0, 1, 1], [], []>} : vector<16x128xbf16>, vector<128x128xbf16>, vector<16x128xf32> -> vector<16x128xf32>
    %c0_29 = arith.constant 0 : index
    %c0_30 = arith.constant 0 : index
    %47 = vector.load %arg7[%c0_29, %c0_30] : memref<16x128xf32, #tpu.memory_space<vmem>>, vector<16x128xf32>
    tpu.vector_store %arg7[%c0_29, %c0_30], %46 {strides = array<i32>} : memref<16x128xf32, #tpu.memory_space<vmem>>, vector<16x128xf32>,
    return
  }
}

</mosaic_0001>

<bundles_post_ra>
// kernel: tpu_custom_call.1
= control target key start
LH: loop header
LB: loop body
LE: loop exit
PB: predicated region body
PF: predicated region fallthrough
CT: control target
= control target key end

     0   :  { %12 = vsyncpa [#allocation3], 0  ;;  %s1554_s0 = inlined_call_operand.hbm [shape: bf16[128,128], index: 0, kind: input, shape index: {}]   ;;  %s1555_s1 = inlined_call_operand.hbm [shape: bf16[128,128], index: 1, kind: input, shape index: {}]   ;;  %s1556_s2 = inlined_call_operand.hbm [shape: bf16[128,128], index: 2, kind: input, shape index: {}]   ;;  %s1557_s3 = inlined_call_operand.vmem [shape: f32[1,128], index: 3, kind: input, shape index: {}]   ;;  %s1558_s4 = inlined_call_operand.hbm [shape: bf16[3,128,128], index: 4, kind: input, shape index: {}]   ;;  %s1559_s5 = inlined_call_operand.vmem [shape: f32[3,1,128], index: 5, kind: input, shape index: {}]   ;;  %s1560_s6 = inlined_call_operand.hbm [shape: bf16[16,128], index: 6, kind: input, shape index: {}]   ;;  %s1561_s7 = inlined_call_operand.hbm [shape: f32[16,128], index: 7, kind: output, shape index: {}]  }
   0x1   :  { %13 = vsyncpa [#allocation6], 0 }
   0x2   :  { %14 = vsyncpa [#allocation9], 0 }
   0x3   :  { %15 = vsyncpa [#allocation4], 0  ;;  %s33_s26 = sshll.u32 %s1555_s1, 4  ;;  %s1434_s27 = smov [#allocation5]   ;;  %s34_s26 = int_to_ptr.hbm [resolvable:$true] %s33_s26 }
   0x4   :  { %s35_s28 = sshll.u32 %s1434_s27, 4  ;;  %s61_s8 = sshll.u32 %s1558_s4, 4  ;;  %s36_s28 = int_to_ptr.vmem [resolvable:$true] %s35_s28  ;;  %s62_s8 = int_to_ptr.hbm [resolvable:$true] %s61_s8 }
   0x5   :  { %s1435_s9 = smov 64   ;;  %s1436_s10 = smov 4  }
   0x6   :  { %41 = dma.hbm_to_vmem [thread:$0]  %s34_s26, 1024, %s36_s28, [#allocation6], %s1435_s9, %s1435_s9, %s1436_s10  }
   0x7   :  { %s1437_s11 = smov [#allocation8]   ;;  %s20_s15 = sshll.u32 %s1554_s0, 4  ;;  %s21_s15 = int_to_ptr.hbm [resolvable:$true] %s20_s15 }
   0x8   :  { %s63_s12 = sshll.u32 %s1437_s11, 4  ;;  %s46_s17 = sshll.u32 %s1556_s2, 4  ;;  %s64_s12 = int_to_ptr.vmem [resolvable:$true] %s63_s12  ;;  %s47_s17 = int_to_ptr.hbm [resolvable:$true] %s46_s17 }
   0x9   :  { %69 = dma.hbm_to_vmem [thread:$0]  %s62_s8, 3072, %s64_s12, [#allocation9], %s1435_s9, %s1435_s9, %s1436_s10  }
   0xa   :  { %s1438_s18 = smov [#allocation2]   ;;  %s1439_s4 = smov [#allocation7]  }
   0xb   :  { %s22_s19 = sshll.u32 %s1438_s18, 4  ;;  %s48_s20 = sshll.u32 %s1439_s4, 4  ;;  %s23_s19 = int_to_ptr.vmem [resolvable:$true] %s22_s19  ;;  %s49_s20 = int_to_ptr.vmem [resolvable:$true] %s48_s20 }
   0xc   :  { %28 = dma.hbm_to_vmem [thread:$0]  %s21_s15, 1024, %s23_s19, [#allocation3], %s1435_s9, %s1435_s9, %s1436_s10  }
   0xd   :  { %s76_s23 = sshll.u32 %s1560_s6, 4  ;;  %s1440_s0 = smov [#allocation10]   ;;  %s77_s23 = int_to_ptr.hbm [resolvable:$true] %s76_s23 }
   0xe   :  { %54 = dma.hbm_to_vmem [thread:$0]  %s47_s17, 1024, %s49_s20, [#allocation6], %s1435_s9, %s1435_s9, %s1436_s10  }
   0xf   :  { %s78_s24 = sshll.u32 %s1440_s0, 4  ;;  %s79_s24 = int_to_ptr.vmem [resolvable:$true] %s78_s24 }
  0x10   :  { %84 = dma.hbm_to_vmem [thread:$0]  %s77_s23, 128, %s79_s24, [#allocation9], %s1435_s9, %s1435_s9, %s1436_s10  }
  0x11   :  { %1426 = dma.done.wait [#allocation3], 1024  }
  0x12   :  { %1427 = vsyncadd [#allocation3], 4294966272 }
  0x13   :  { %1428 = dma.done.wait [#allocation6], 2048  }
  0x14   :  { %1429 = vsyncadd [#allocation6], 4294965248 }
  0x15   :  { %1430 = dma.done.wait [#allocation9], 3200  }
  0x16   :  { %1431 = vsyncadd [#allocation9], 4294964096  ;;  %v1218_v0 = vld [vmem:[#allocation7 + $0x38] sm:$0xff]  ;;  %v1217_v1 = vld [vmem:[#allocation7 + $0x30] sm:$0xff]  ;;  %s984_s10 = sshll.u32 %s1561_s7, 4  ;;  %s1442_s11 = smov 128   ;;  %s985_s10 = int_to_ptr.hbm [resolvable:$true] %s984_s10 }
  0x17   :  { %256 = vmatpush.bf16.msra.mxu0 %v1218_v0  ;;  %1244 = vmatpush.bf16.msra.mxu3 %v1218_v0  ;;  %v1216_v2 = vld [vmem:[#allocation7 + $0x28] sm:$0xff]  ;;  %v1215_v3 = vld [vmem:[#allocation7 + $0x20] sm:$0xff]  ;;  %v1214_v4 = vld [vmem:[#allocation7 + $0x18] sm:$0xff]  ;;  %s1443_s12 = smov 8  }
  0x18   :  { %v1213_v5 = vld [vmem:[#allocation7 + $0x10] sm:$0xff]  ;;  %v1212_v6 = vld [vmem:[#allocation7 + $0x8] sm:$0xff]  ;;  %v1211_v7 = vld [vmem:[#allocation7] sm:$0xff] }
  0x19   :  { %v1203_v8 = vld [vmem:[#allocation2] sm:$0xff]  ;;  %v1205_v9 = vld [vmem:[#allocation2 + $0x10] sm:$0xff]  ;;  %v1204_v10 = vld [vmem:[#allocation2 + $0x8] sm:$0xff] }
  0x1a   :  { %v1206_v11 = vld [vmem:[#allocation2 + $0x18] sm:$0xff]  ;;  %v1207_v12 = vld [vmem:[#allocation2 + $0x20] sm:$0xff]  ;;  %v1208_v13 = vld [vmem:[#allocation2 + $0x28] sm:$0xff] }
  0x1b   :  { %257 = vmatpush.bf16.msra.mxu0 %v1217_v1  ;;  %1245 = vmatpush.bf16.msra.mxu3 %v1217_v1  ;;  %v1226_v14 = vld [vmem:[#allocation8 + $0x38] sm:$0xff]  ;;  %v1225_v15 = vld [vmem:[#allocation8 + $0x30] sm:$0xff]  ;;  %v1224_v16 = vld [vmem:[#allocation8 + $0x28] sm:$0xff] }
  0x1c   :  { %377 = vmatpush.bf16.msra.mxu1 %v1226_v14  ;;  %v1223_v17 = vld [vmem:[#allocation8 + $0x20] sm:$0xff]  ;;  %v1209_v18 = vld [vmem:[#allocation2 + $0x30] sm:$0xff]  ;;  %v1222_v19 = vld [vmem:[#allocation8 + $0x18] sm:$0xff] }
  0x1d   :  { %v1210_v20 = vld [vmem:[#allocation2 + $0x38] sm:$0xff]  ;;  %v1221_v21 = vld [vmem:[#allocation8 + $0x10] sm:$0xff]  ;;  %v1220_v22 = vld [vmem:[#allocation8 + $0x8] sm:$0xff] }
  0x1e   :  { %v1219_v23 = vld [vmem:[#allocation8] sm:$0xff] }
  0x1f   :  { %258 = vmatpush.bf16.msra.mxu0 %v1216_v2  ;;  %1246 = vmatpush.bf16.msra.mxu3 %v1216_v2  ;;  %v1278_v25 = vld [vmem:[%s1557_s3] ss:$0 sm:$0xff] }
  0x20   :  { %378 = vmatpush.bf16.msra.mxu1 %v1225_v15 }
  0x23   :  { %259 = vmatpush.bf16.msra.mxu0 %v1215_v3  ;;  %1247 = vmatpush.bf16.msra.mxu3 %v1215_v3 }
  0x24   :  { %379 = vmatpush.bf16.msra.mxu1 %v1224_v16 }
  0x27   :  { %260 = vmatpush.bf16.msra.mxu0 %v1214_v4  ;;  %1248 = vmatpush.bf16.msra.mxu3 %v1214_v4 }
  0x28   :  { %380 = vmatpush.bf16.msra.mxu1 %v1223_v17 }
  0x2b   :  { %261 = vmatpush.bf16.msra.mxu0 %v1213_v5  ;;  %1249 = vmatpush.bf16.msra.mxu3 %v1213_v5 }
  0x2c   :  { %381 = vmatpush.bf16.msra.mxu1 %v1222_v19 }
  0x2f   :  { %262 = vmatpush.bf16.msra.mxu0 %v1212_v6  ;;  %1250 = vmatpush.bf16.msra.mxu3 %v1212_v6 }
  0x30   :  { %382 = vmatpush.bf16.msra.mxu1 %v1221_v21 }
  0x33   :  { %263 = vmatpush.bf16.msra.mxu0 %v1211_v7  ;;  %1251 = vmatpush.bf16.msra.mxu3 %v1211_v7 }
  0x34   :  { %383 = vmatpush.bf16.msra.mxu1 %v1220_v22 }
  0x36   :  { %264 = vmatmul.bf16.vlgmr.msra.gmra.mxu0 %v1203_v8  ;;  %274 = vmatmul.bf16.vlgmr.msra.gmra.mxu3 %v1205_v9 }
  0x38   :  { %384 = vmatpush.bf16.msra.mxu1 %v1219_v23 }
  0x46   :  { %269 = vmatmul.bf16.gmra.mxu0 %v1204_v10  ;;  %279 = vmatmul.bf16.gmra.mxu3 %v1206_v11 }
  0x56   :  { %284 = vmatmul.bf16.gmra.mxu3 %v1207_v12 }
  0x66   :  { %289 = vmatmul.bf16.gmra.mxu3 %v1208_v13 }
  0x76   :  { %294 = vmatmul.bf16.gmra.mxu3 %v1209_v18 }
  0x86   :  { %299 = vmatmul.bf16.gmra.mxu3 %v1210_v20 }
  0xb3   :  { %v265_v24 = vpop.f32.mrf.mxu0 }
  0xb4   :  { %v266_v28 = vadd.f32 %v1278_v25, %v265_v24 }
  0xb9   :  { %v275_v26 = vpop.f32.mrf.mxu3 }
  0xba   :  { %v276_v39 = vadd.f32 %v1278_v25, %v275_v26  ;;  %v1505_v26 = vld [vmem:[#allocation5 + $0x8] sm:$0xff] }
  0xbb   :  { %v267_v27 = vpop.f32.mrf.mxu0 }
  0xbc   :  { %v268_v29 = vadd.f32 %v1278_v25, %v267_v27  ;;  %v1508_v27 = vld [vmem:[#allocation5 + $0x10] sm:$0xff] }
  0xbe   :  { %v305_v30 = vpack.c.bf16 %v268_v29, %v266_v28  ;;  %v1511_v28 = vld [vmem:[#allocation5 + $0x18] sm:$0xff]  ;;  %v1514_v29 = vld [vmem:[#allocation5 + $0x20] sm:$0xff] }
  0xc0   :  { %385 = vmatmul.bf16.vlgmr.msra.gmra.mxu1 %v305_v30  ;;  %v1517_v30 = vld [vmem:[#allocation5 + $0x28] sm:$0xff] }
  0xc1   :  { %v277_v32 = vpop.f32.mrf.mxu3 }
  0xc2   :  { %v278_v40 = vadd.f32 %v1278_v25, %v277_v32  ;;  %v1233_v32 = vld [vmem:[#allocation8 + $0x70] sm:$0xff] }
  0xc3   :  { %v270_v31 = vpop.f32.mrf.mxu0 }
  0xc4   :  { %v271_v34 = vadd.f32 %v1278_v25, %v270_v31  ;;  %v307_v41 = vpack.c.bf16 %v278_v40, %v276_v39  ;;  %v1234_v31 = vld [vmem:[#allocation8 + $0x78] sm:$0xff]  ;;  %v1227_v40 = vld [vmem:[#allocation8 + $0x40] sm:$0xff] }
  0xc5   :  { %623 = vmatpush.bf16.msrb.mxu3 %v1234_v31  ;;  %v1523_v39 = vld [vmem:[#allocation5 + $0x38] sm:$0xff] }
  0xc9   :  { %v280_v36 = vpop.f32.mrf.mxu3  ;;  %624 = vmatpush.bf16.msrb.mxu3 %v1233_v32 }
  0xca   :  { %v281_v43 = vadd.f32 %v1278_v25, %v280_v36  ;;  %v1230_v36 = vld [vmem:[#allocation8 + $0x58] sm:$0xff] }
  0xcb   :  { %v272_v33 = vpop.f32.mrf.mxu0 }
  0xcc   :  { %v273_v35 = vadd.f32 %v1278_v25, %v272_v33  ;;  %v1232_v33 = vld [vmem:[#allocation8 + $0x68] sm:$0xff] }
  0xcd   :  { %625 = vmatpush.bf16.msrb.mxu3 %v1232_v33 }
  0xce   :  { %v306_v37 = vpack.c.bf16 %v273_v35, %v271_v34  ;;  %v1231_v34 = vld [vmem:[#allocation8 + $0x60] sm:$0xff]  ;;  %v1520_v35 = vld [vmem:[#allocation5 + $0x30] sm:$0xff] }
  0xd0   :  { %390 = vmatmul.bf16.gmra.mxu1 %v306_v37  ;;  %v1229_v37 = vld [vmem:[#allocation8 + $0x50] sm:$0xff] }
  0xd1   :  { %v282_v38 = vpop.f32.mrf.mxu3  ;;  %626 = vmatpush.bf16.msrb.mxu3 %v1231_v34 }
  0xd2   :  { %v283_v44 = vadd.f32 %v1278_v25, %v282_v38  ;;  %v1228_v38 = vld [vmem:[#allocation8 + $0x48] sm:$0xff] }
  0xd4   :  { %v308_v46 = vpack.c.bf16 %v283_v44, %v281_v43 }
  0xd5   :  { %627 = vmatpush.bf16.msrb.mxu3 %v1230_v36 }
  0xd9   :  { %v285_v42 = vpop.f32.mrf.mxu3  ;;  %628 = vmatpush.bf16.msrb.mxu3 %v1229_v37 }
  0xda   :  { %v286_v48 = vadd.f32 %v1278_v25, %v285_v42  ;;  %v1279_v42 = vld [vmem:[%s1559_s5] ss:$0 sm:$0xff] }
  0xdd   :  { %629 = vmatpush.bf16.msrb.mxu3 %v1228_v38 }
  0xe0   :  { %395 = vmatmul.bf16.gmra.mxu1 %v307_v41 }
  0xe1   :  { %v287_v45 = vpop.f32.mrf.mxu3  ;;  %630 = vmatpush.bf16.msrb.mxu3 %v1227_v40 }
  0xe2   :  { %v288_v49 = vadd.f32 %v1278_v25, %v287_v45 }
  0xe4   :  { %v309_v50 = vpack.c.bf16 %v288_v49, %v286_v48 }
  0xe9   :  { %v290_v47 = vpop.f32.mrf.mxu3 }
  0xea   :  { %v291_v53 = vadd.f32 %v1278_v25, %v290_v47 }
  0xf0   :  { %400 = vmatmul.bf16.gmra.mxu1 %v308_v46 }
  0xf1   :  { %v292_v51 = vpop.f32.mrf.mxu3 }
  0xf2   :  { %v293_v54 = vadd.f32 %v1278_v25, %v292_v51 }
  0xf4   :  { %v310_v55 = vpack.c.bf16 %v293_v54, %v291_v53 }
  0xf9   :  { %v295_v52 = vpop.f32.mrf.mxu3 }
  0xfa   :  { %v296_v57 = vadd.f32 %v1278_v25, %v295_v52 }
 0x100   :  { %405 = vmatmul.bf16.gmra.mxu1 %v309_v50 }
 0x101   :  { %v297_v56 = vpop.f32.mrf.mxu3 }
 0x102   :  { %v298_v58 = vadd.f32 %v1278_v25, %v297_v56 }
 0x104   :  { %v311_v60 = vpack.c.bf16 %v298_v58, %v296_v57 }
 0x109   :  { %v300_v59 = vpop.f32.mrf.mxu3 }
 0x10a   :  { %v301_v62 = vadd.f32 %v1278_v25, %v300_v59 }
 0x110   :  { %410 = vmatmul.bf16.gmra.mxu1 %v310_v55 }
 0x111   :  { %v302_v61 = vpop.f32.mrf.mxu3 }
 0x112   :  { %v303_v63 = vadd.f32 %v1278_v25, %v302_v61  ;;  %v1502_v25 = vld [vmem:[#allocation5] sm:$0xff] }
 0x114   :  { %v312_v0 = vpack.c.bf16 %v303_v63, %v301_v62 }
 0x120   :  { %415 = vmatmul.bf16.gmra.mxu1 %v311_v60 }
 0x130   :  { %420 = vmatmul.bf16.gmra.mxu1 %v312_v0 }
 0x13d   :  { %v386_v1 = vpop.f32.mrf.mxu1 }
 0x145   :  { %v388_v2 = vpop.f32.mrf.mxu1 }
 0x146   :  { %v426_v24 = vpack.c.bf16 %v388_v2, %v386_v1 }
 0x14d   :  { %v391_v3 = vpop.f32.mrf.mxu1 }
 0x155   :  { %v393_v4 = vpop.f32.mrf.mxu1 }
 0x156   :  { %v427_v23 = vpack.c.bf16 %v393_v4, %v391_v3 }
 0x15d   :  { %v396_v5 = vpop.f32.mrf.mxu1 }
 0x165   :  { %v398_v6 = vpop.f32.mrf.mxu1 }
 0x166   :  { %v428_v22 = vpack.c.bf16 %v398_v6, %v396_v5 }
 0x16d   :  { %v401_v7 = vpop.f32.mrf.mxu1 }
 0x175   :  { %v403_v8 = vpop.f32.mrf.mxu1 }
 0x176   :  { %v429_v9 = vpack.c.bf16 %v403_v8, %v401_v7 }
 0x17d   :  { %v406_v10 = vpop.f32.mrf.mxu1 }
 0x185   :  { %v408_v11 = vpop.f32.mrf.mxu1 }
 0x186   :  { %v430_v21 = vpack.c.bf16 %v408_v11, %v406_v10 }
 0x18d   :  { %v411_v12 = vpop.f32.mrf.mxu1 }
 0x195   :  { %v413_v13 = vpop.f32.mrf.mxu1 }
 0x196   :  { %v431_v20 = vpack.c.bf16 %v413_v13, %v411_v12 }
 0x19d   :  { %v416_v14 = vpop.f32.mrf.mxu1 }
 0x1a5   :  { %v418_v15 = vpop.f32.mrf.mxu1 }
 0x1a6   :  { %v432_v19 = vpack.c.bf16 %v418_v15, %v416_v14 }
 0x1ad   :  { %v421_v16 = vpop.f32.mrf.mxu1 }
 0x1b5   :  { %v423_v17 = vpop.f32.mrf.mxu1 }
 0x1b6   :  { %v433_v18 = vpack.c.bf16 %v423_v17, %v421_v16 }
 0x1b8   :  { %485 = vmatpush.bf16.msra.mxu2 %v433_v18 }
 0x1bc   :  { %486 = vmatpush.bf16.msra.mxu2 %v432_v19 }
 0x1c0   :  { %487 = vmatpush.bf16.msra.mxu2 %v431_v20 }
 0x1c4   :  { %488 = vmatpush.bf16.msra.mxu2 %v430_v21 }
 0x1c8   :  { %489 = vmatpush.bf16.msra.mxu2 %v429_v9 }
 0x1cc   :  { %490 = vmatpush.bf16.msra.mxu2 %v428_v22 }
 0x1d0   :  { %491 = vmatpush.bf16.msra.mxu2 %v427_v23 }
 0x1d4   :  { %492 = vmatpush.bf16.msra.mxu2 %v426_v24 }
 0x1d7   :  { %493 = vmatmul.bf16.vlgmr.msra.gmra.mxu2 %v1502_v25 }
 0x1e7   :  { %498 = vmatmul.bf16.gmra.mxu2 %v1505_v26 }
 0x1f7   :  { %503 = vmatmul.bf16.gmra.mxu2 %v1508_v27 }
 0x207   :  { %508 = vmatmul.bf16.gmra.mxu2 %v1511_v28 }
 0x217   :  { %513 = vmatmul.bf16.gmra.mxu2 %v1514_v29 }
 0x227   :  { %518 = vmatmul.bf16.gmra.mxu2 %v1517_v30 }
 0x237   :  { %523 = vmatmul.bf16.gmra.mxu2 %v1520_v35 }
 0x247   :  { %528 = vmatmul.bf16.gmra.mxu2 %v1523_v39 }
 0x25a   :  { %v494_v41 = vpop.f32.mrf.mxu2 }
 0x25b   :  { %v495_v43 = vadd.f32 %v1279_v42, %v494_v41 }
 0x25d   :  { %v534_v46 = vmax.f32 %v495_v43, 0.0 }
 0x262   :  { %v496_v44 = vpop.f32.mrf.mxu2 }
 0x263   :  { %v497_v45 = vadd.f32 %v1279_v42, %v496_v44 }
 0x265   :  { %v535_v47 = vmax.f32 %v497_v45, 0.0 }
 0x267   :  { %v550_v48 = vpack.c.bf16 %v535_v47, %v534_v46 }
 0x269   :  { %631 = vmatmul.bf16.vlgmr.msrb.gmra.mxu3 %v550_v48 }
 0x26a   :  { %v499_v49 = vpop.f32.mrf.mxu2 }
 0x26b   :  { %v500_v50 = vadd.f32 %v1279_v42, %v499_v49 }
 0x26d   :  { %v536_v53 = vmax.f32 %v500_v50, 0.0 }
 0x272   :  { %v501_v51 = vpop.f32.mrf.mxu2 }
 0x273   :  { %v502_v52 = vadd.f32 %v1279_v42, %v501_v51 }
 0x275   :  { %v537_v54 = vmax.f32 %v502_v52, 0.0 }
 0x277   :  { %v551_v55 = vpack.c.bf16 %v537_v54, %v536_v53 }
 0x279   :  { %636 = vmatmul.bf16.gmra.mxu3 %v551_v55 }
 0x27a   :  { %v504_v56 = vpop.f32.mrf.mxu2 }
 0x27b   :  { %v505_v57 = vadd.f32 %v1279_v42, %v504_v56 }
 0x27d   :  { %v538_v60 = vmax.f32 %v505_v57, 0.0 }
 0x282   :  { %v506_v58 = vpop.f32.mrf.mxu2 }
 0x283   :  { %v507_v59 = vadd.f32 %v1279_v42, %v506_v58 }
 0x285   :  { %v539_v61 = vmax.f32 %v507_v59, 0.0 }
 0x287   :  { %v552_v62 = vpack.c.bf16 %v539_v61, %v538_v60 }
 0x289   :  { %641 = vmatmul.bf16.gmra.mxu3 %v552_v62 }
 0x28a   :  { %v509_v63 = vpop.f32.mrf.mxu2 }
 0x28b   :  { %v510_v0 = vadd.f32 %v1279_v42, %v509_v63 }
 0x28d   :  { %v540_v3 = vmax.f32 %v510_v0, 0.0 }
 0x292   :  { %v511_v1 = vpop.f32.mrf.mxu2 }
 0x293   :  { %v512_v2 = vadd.f32 %v1279_v42, %v511_v1 }
 0x295   :  { %v541_v4 = vmax.f32 %v512_v2, 0.0  ;;  %v1242_v2 = vld [vmem:[#allocation8 + $0xb8] sm:$0xff] }
 0x296   :  { %1252 = vmatpush.bf16.msrb.mxu1 %v1242_v2 }
 0x297   :  { %v553_v5 = vpack.c.bf16 %v541_v4, %v540_v3  ;;  %v1241_v3 = vld [vmem:[#allocation8 + $0xb0] sm:$0xff]  ;;  %v1240_v4 = vld [vmem:[#allocation8 + $0xa8] sm:$0xff] }
 0x299   :  { %646 = vmatmul.bf16.gmra.mxu3 %v553_v5  ;;  %v1239_v5 = vld [vmem:[#allocation8 + $0xa0] sm:$0xff] }
 0x29a   :  { %v514_v6 = vpop.f32.mrf.mxu2  ;;  %1253 = vmatpush.bf16.msrb.mxu1 %v1241_v3 }
 0x29b   :  { %v515_v7 = vadd.f32 %v1279_v42, %v514_v6  ;;  %v1238_v6 = vld [vmem:[#allocation8 + $0x98] sm:$0xff] }
 0x29d   :  { %v542_v10 = vmax.f32 %v515_v7, 0.0  ;;  %v1237_v7 = vld [vmem:[#allocation8 + $0x90] sm:$0xff] }
 0x29e   :  { %1254 = vmatpush.bf16.msrb.mxu1 %v1240_v4 }
 0x2a2   :  { %v516_v8 = vpop.f32.mrf.mxu2  ;;  %1255 = vmatpush.bf16.msrb.mxu1 %v1239_v5 }
 0x2a3   :  { %v517_v9 = vadd.f32 %v1279_v42, %v516_v8  ;;  %v1236_v8 = vld [vmem:[#allocation8 + $0x88] sm:$0xff] }
 0x2a5   :  { %v543_v11 = vmax.f32 %v517_v9, 0.0  ;;  %v1235_v9 = vld [vmem:[#allocation8 + $0x80] sm:$0xff] }
 0x2a6   :  { %1256 = vmatpush.bf16.msrb.mxu1 %v1238_v6 }
 0x2a7   :  { %v554_v12 = vpack.c.bf16 %v543_v11, %v542_v10  ;;  %v1280_v11 = vld [vmem:[%s1559_s5 + $0x1] ss:$0 sm:$0xff] }
 0x2a9   :  { %651 = vmatmul.bf16.gmra.mxu3 %v554_v12 }
 0x2aa   :  { %v519_v13 = vpop.f32.mrf.mxu2  ;;  %1257 = vmatpush.bf16.msrb.mxu1 %v1237_v7 }
 0x2ab   :  { %v520_v14 = vadd.f32 %v1279_v42, %v519_v13 }
 0x2ad   :  { %v544_v17 = vmax.f32 %v520_v14, 0.0 }
 0x2ae   :  { %1258 = vmatpush.bf16.msrb.mxu1 %v1236_v8 }
 0x2b2   :  { %v521_v15 = vpop.f32.mrf.mxu2  ;;  %1259 = vmatpush.bf16.msrb.mxu1 %v1235_v9 }
 0x2b3   :  { %v522_v16 = vadd.f32 %v1279_v42, %v521_v15 }
 0x2b5   :  { %v545_v18 = vmax.f32 %v522_v16, 0.0 }
 0x2b7   :  { %v555_v19 = vpack.c.bf16 %v545_v18, %v544_v17 }
 0x2b9   :  { %656 = vmatmul.bf16.gmra.mxu3 %v555_v19 }
 0x2ba   :  { %v524_v20 = vpop.f32.mrf.mxu2 }
 0x2bb   :  { %v525_v21 = vadd.f32 %v1279_v42, %v524_v20 }
 0x2bd   :  { %v546_v24 = vmax.f32 %v525_v21, 0.0 }
 0x2c2   :  { %v526_v22 = vpop.f32.mrf.mxu2 }
 0x2c3   :  { %v527_v23 = vadd.f32 %v1279_v42, %v526_v22 }
 0x2c5   :  { %v547_v31 = vmax.f32 %v527_v23, 0.0 }
 0x2c7   :  { %v556_v32 = vpack.c.bf16 %v547_v31, %v546_v24 }
 0x2c9   :  { %661 = vmatmul.bf16.gmra.mxu3 %v556_v32 }
 0x2ca   :  { %v529_v33 = vpop.f32.mrf.mxu2 }
 0x2cb   :  { %v530_v34 = vadd.f32 %v1279_v42, %v529_v33 }
 0x2cd   :  { %v548_v38 = vmax.f32 %v530_v34, 0.0 }
 0x2d2   :  { %v531_v36 = vpop.f32.mrf.mxu2 }
 0x2d3   :  { %v532_v37 = vadd.f32 %v1279_v42, %v531_v36 }
 0x2d5   :  { %v549_v40 = vmax.f32 %v532_v37, 0.0 }
 0x2d7   :  { %v557_v41 = vpack.c.bf16 %v549_v40, %v548_v38 }
 0x2d9   :  { %666 = vmatmul.bf16.gmra.mxu3 %v557_v41 }
 0x2ec   :  { %v632_v43 = vpop.f32.mrf.mxu3 }
 0x2f4   :  { %v634_v44 = vpop.f32.mrf.mxu3 }
 0x2f5   :  { %v672_v45 = vpack.c.bf16 %v634_v44, %v632_v43 }
 0x2fc   :  { %v637_v46 = vpop.f32.mrf.mxu3 }
 0x304   :  { %v639_v47 = vpop.f32.mrf.mxu3 }
 0x305   :  { %v673_v48 = vpack.c.bf16 %v639_v47, %v637_v46 }
 0x30c   :  { %v642_v49 = vpop.f32.mrf.mxu3 }
 0x314   :  { %v644_v50 = vpop.f32.mrf.mxu3 }
 0x315   :  { %v674_v51 = vpack.c.bf16 %v644_v50, %v642_v49 }
 0x31c   :  { %v647_v52 = vpop.f32.mrf.mxu3 }
 0x324   :  { %v649_v53 = vpop.f32.mrf.mxu3 }
 0x325   :  { %v675_v54 = vpack.c.bf16 %v649_v53, %v647_v52 }
 0x32c   :  { %v652_v55 = vpop.f32.mrf.mxu3 }
 0x334   :  { %v654_v56 = vpop.f32.mrf.mxu3 }
 0x335   :  { %v676_v1 = vpack.c.bf16 %v654_v56, %v652_v55 }
 0x33c   :  { %v657_v57 = vpop.f32.mrf.mxu3 }
 0x344   :  { %v659_v42 = vpop.f32.mrf.mxu3 }
 0x345   :  { %v677_v0 = vpack.c.bf16 %v659_v42, %v657_v57 }
 0x34c   :  { %v662_v58 = vpop.f32.mrf.mxu3 }
 0x354   :  { %v664_v59 = vpop.f32.mrf.mxu3 }
 0x355   :  { %v678_v63 = vpack.c.bf16 %v664_v59, %v662_v58 }
 0x35c   :  { %v667_v60 = vpop.f32.mrf.mxu3 }
 0x364   :  { %v669_v61 = vpop.f32.mrf.mxu3 }
 0x365   :  { %v679_v62 = vpack.c.bf16 %v669_v61, %v667_v60 }
 0x367   :  { %683 = vmatpush.bf16.msrb.mxu0 %v679_v62 }
 0x36b   :  { %684 = vmatpush.bf16.msrb.mxu0 %v678_v63 }
 0x36f   :  { %685 = vmatpush.bf16.msrb.mxu0 %v677_v0 }
 0x373   :  { %686 = vmatpush.bf16.msrb.mxu0 %v676_v1 }
 0x377   :  { %687 = vmatpush.bf16.msrb.mxu0 %v675_v54 }
 0x37b   :  { %688 = vmatpush.bf16.msrb.mxu0 %v674_v51 }
 0x37f   :  { %689 = vmatpush.bf16.msrb.mxu0 %v673_v48 }
 0x383   :  { %690 = vmatpush.bf16.msrb.mxu0 %v672_v45 }
 0x386   :  { %691 = vmatmul.bf16.vlgmr.msrb.gmra.mxu0 %v1502_v25 }
 0x387   :  { %821 = vmatpush.bf16.msra.mxu0 %v1242_v2 }
 0x38b   :  { %822 = vmatpush.bf16.msra.mxu0 %v1241_v3 }
 0x38f   :  { %823 = vmatpush.bf16.msra.mxu0 %v1240_v4 }
 0x393   :  { %824 = vmatpush.bf16.msra.mxu0 %v1239_v5 }
 0x396   :  { %696 = vmatmul.bf16.gmra.mxu0 %v1505_v26 }
 0x397   :  { %825 = vmatpush.bf16.msra.mxu0 %v1238_v6 }
 0x39b   :  { %826 = vmatpush.bf16.msra.mxu0 %v1237_v7 }
 0x39f   :  { %827 = vmatpush.bf16.msra.mxu0 %v1236_v8 }
 0x3a3   :  { %828 = vmatpush.bf16.msra.mxu0 %v1235_v9 }
 0x3a6   :  { %701 = vmatmul.bf16.gmra.mxu0 %v1508_v27 }
 0x3b6   :  { %706 = vmatmul.bf16.gmra.mxu0 %v1511_v28 }
 0x3c6   :  { %711 = vmatmul.bf16.gmra.mxu0 %v1514_v29 }
 0x3d6   :  { %716 = vmatmul.bf16.gmra.mxu0 %v1517_v30 }
 0x3e6   :  { %721 = vmatmul.bf16.gmra.mxu0 %v1520_v35 }
 0x3f6   :  { %726 = vmatmul.bf16.gmra.mxu0 %v1523_v39 }
 0x403   :  { %v692_v10 = vpop.f32.mrf.mxu0 }
 0x404   :  { %v693_v12 = vadd.f32 %v1280_v11, %v692_v10 }
 0x406   :  { %v732_v15 = vmax.f32 %v693_v12, 0.0 }
 0x40b   :  { %v694_v13 = vpop.f32.mrf.mxu0 }
 0x40c   :  { %v695_v14 = vadd.f32 %v1280_v11, %v694_v13 }
 0x40e   :  { %v733_v16 = vmax.f32 %v695_v14, 0.0 }
 0x410   :  { %v748_v17 = vpack.c.bf16 %v733_v16, %v732_v15 }
 0x412   :  { %829 = vmatmul.bf16.vlgmr.msra.gmra.mxu0 %v748_v17 }
 0x413   :  { %v697_v18 = vpop.f32.mrf.mxu0 }
 0x414   :  { %v698_v19 = vadd.f32 %v1280_v11, %v697_v18 }
 0x416   :  { %v734_v22 = vmax.f32 %v698_v19, 0.0 }
 0x41b   :  { %v699_v20 = vpop.f32.mrf.mxu0 }
 0x41c   :  { %v700_v21 = vadd.f32 %v1280_v11, %v699_v20 }
 0x41e   :  { %v735_v23 = vmax.f32 %v700_v21, 0.0 }
 0x420   :  { %v749_v24 = vpack.c.bf16 %v735_v23, %v734_v22 }
 0x422   :  { %834 = vmatmul.bf16.vlgmr.msrb.gmra.mxu1 %v749_v24 }
 0x423   :  { %v702_v31 = vpop.f32.mrf.mxu0 }
 0x424   :  { %v703_v32 = vadd.f32 %v1280_v11, %v702_v31 }
 0x426   :  { %v736_v36 = vmax.f32 %v703_v32, 0.0 }
 0x42b   :  { %v704_v33 = vpop.f32.mrf.mxu0 }
 0x42c   :  { %v705_v34 = vadd.f32 %v1280_v11, %v704_v33 }
 0x42e   :  { %v737_v37 = vmax.f32 %v705_v34, 0.0 }
 0x430   :  { %v750_v38 = vpack.c.bf16 %v737_v37, %v736_v36 }
 0x432   :  { %839 = vmatmul.bf16.gmra.mxu1 %v750_v38 }
 0x433   :  { %v707_v40 = vpop.f32.mrf.mxu0 }
 0x434   :  { %v708_v41 = vadd.f32 %v1280_v11, %v707_v40 }
 0x436   :  { %v738_v45 = vmax.f32 %v708_v41, 0.0 }
 0x43b   :  { %v709_v43 = vpop.f32.mrf.mxu0 }
 0x43c   :  { %v710_v44 = vadd.f32 %v1280_v11, %v709_v43 }
 0x43e   :  { %v739_v46 = vmax.f32 %v710_v44, 0.0 }
 0x440   :  { %v751_v47 = vpack.c.bf16 %v739_v46, %v738_v45  ;;  %v1281_v45 = vld [vmem:[%s1559_s5 + $0x2] ss:$0 sm:$0xff]  ;;  %s1441_s5 = smov [#allocation11]  }
 0x441   :  { %s982_s30 = sshll.u32 %s1441_s5, 4  ;;  %s983_s30 = int_to_ptr.vmem [resolvable:$true] %s982_s30 }
 0x442   :  { %844 = vmatmul.bf16.gmra.mxu1 %v751_v47 }
 0x443   :  { %v712_v48 = vpop.f32.mrf.mxu0 }
 0x444   :  { %v713_v49 = vadd.f32 %v1280_v11, %v712_v48 }
 0x446   :  { %v740_v52 = vmax.f32 %v713_v49, 0.0 }
 0x44b   :  { %v714_v50 = vpop.f32.mrf.mxu0 }
 0x44c   :  { %v715_v51 = vadd.f32 %v1280_v11, %v714_v50 }
 0x44e   :  { %v741_v53 = vmax.f32 %v715_v51, 0.0 }
 0x450   :  { %v752_v54 = vpack.c.bf16 %v741_v53, %v740_v52 }
 0x452   :  { %849 = vmatmul.bf16.gmra.mxu1 %v752_v54 }
 0x453   :  { %v717_v55 = vpop.f32.mrf.mxu0 }
 0x454   :  { %v718_v56 = vadd.f32 %v1280_v11, %v717_v55 }
 0x456   :  { %v742_v58 = vmax.f32 %v718_v56, 0.0 }
 0x45b   :  { %v719_v57 = vpop.f32.mrf.mxu0 }
 0x45c   :  { %v720_v42 = vadd.f32 %v1280_v11, %v719_v57 }
 0x45e   :  { %v743_v59 = vmax.f32 %v720_v42, 0.0 }
 0x460   :  { %v753_v60 = vpack.c.bf16 %v743_v59, %v742_v58 }
 0x462   :  { %854 = vmatmul.bf16.gmra.mxu1 %v753_v60 }
 0x463   :  { %v722_v61 = vpop.f32.mrf.mxu0 }
 0x464   :  { %v723_v62 = vadd.f32 %v1280_v11, %v722_v61 }
 0x466   :  { %v744_v1 = vmax.f32 %v723_v62, 0.0 }
 0x46b   :  { %v724_v63 = vpop.f32.mrf.mxu0 }
 0x46c   :  { %v725_v0 = vadd.f32 %v1280_v11, %v724_v63 }
 0x46e   :  { %v745_v2 = vmax.f32 %v725_v0, 0.0 }
 0x470   :  { %v754_v3 = vpack.c.bf16 %v745_v2, %v744_v1 }
 0x472   :  { %859 = vmatmul.bf16.gmra.mxu1 %v754_v3 }
 0x473   :  { %v727_v4 = vpop.f32.mrf.mxu0 }
 0x474   :  { %v728_v5 = vadd.f32 %v1280_v11, %v727_v4 }
 0x476   :  { %v746_v8 = vmax.f32 %v728_v5, 0.0 }
 0x47b   :  { %v729_v6 = vpop.f32.mrf.mxu0 }
 0x47c   :  { %v730_v7 = vadd.f32 %v1280_v11, %v729_v6 }
 0x47e   :  { %v747_v9 = vmax.f32 %v730_v7, 0.0 }
 0x480   :  { %v755_v10 = vpack.c.bf16 %v747_v9, %v746_v8 }
 0x482   :  { %864 = vmatmul.bf16.gmra.mxu1 %v755_v10 }
 0x48f   :  { %v830_v40 = vpop.f32.mrf.mxu0 }
 0x497   :  { %v832_v41 = vpop.f32.mrf.mxu0 }
 0x498   :  { %v870_v43 = vpack.c.bf16 %v832_v41, %v830_v40 }
 0x49f   :  { %v835_v12 = vpop.f32.mrf.mxu1 }
 0x4a7   :  { %v837_v13 = vpop.f32.mrf.mxu1 }
 0x4a8   :  { %v871_v14 = vpack.c.bf16 %v837_v13, %v835_v12 }
 0x4af   :  { %v840_v15 = vpop.f32.mrf.mxu1 }
 0x4b7   :  { %v842_v16 = vpop.f32.mrf.mxu1 }
 0x4b8   :  { %v872_v17 = vpack.c.bf16 %v842_v16, %v840_v15 }
 0x4bf   :  { %v845_v18 = vpop.f32.mrf.mxu1 }
 0x4c7   :  { %v847_v19 = vpop.f32.mrf.mxu1 }
 0x4c8   :  { %v873_v20 = vpack.c.bf16 %v847_v19, %v845_v18 }
 0x4cf   :  { %v850_v21 = vpop.f32.mrf.mxu1 }
 0x4d7   :  { %v852_v22 = vpop.f32.mrf.mxu1 }
 0x4d8   :  { %v874_v38 = vpack.c.bf16 %v852_v22, %v850_v21 }
 0x4df   :  { %v855_v23 = vpop.f32.mrf.mxu1 }
 0x4e7   :  { %v857_v24 = vpop.f32.mrf.mxu1 }
 0x4e8   :  { %v875_v37 = vpack.c.bf16 %v857_v24, %v855_v23 }
 0x4ef   :  { %v860_v31 = vpop.f32.mrf.mxu1 }
 0x4f7   :  { %v862_v32 = vpop.f32.mrf.mxu1 }
 0x4f8   :  { %v876_v36 = vpack.c.bf16 %v862_v32, %v860_v31 }
 0x4ff   :  { %v865_v11 = vpop.f32.mrf.mxu1 }
 0x507   :  { %v867_v33 = vpop.f32.mrf.mxu1 }
 0x508   :  { %v877_v34 = vpack.c.bf16 %v867_v33, %v865_v11 }
 0x50a   :  { %881 = vmatpush.bf16.msrb.mxu0 %v877_v34  ;;  %1260 = vmatpush.bf16.msrb.mxu2 %v877_v34  ;;  %v1243_v34 = vld [vmem:[#allocation10] sm:$0xff] }
 0x50e   :  { %882 = vmatpush.bf16.msrb.mxu0 %v876_v36  ;;  %1261 = vmatpush.bf16.msrb.mxu2 %v876_v36 }
 0x512   :  { %883 = vmatpush.bf16.msrb.mxu0 %v875_v37  ;;  %1262 = vmatpush.bf16.msrb.mxu2 %v875_v37 }
 0x516   :  { %884 = vmatpush.bf16.msrb.mxu0 %v874_v38  ;;  %1263 = vmatpush.bf16.msrb.mxu2 %v874_v38 }
 0x51a   :  { %885 = vmatpush.bf16.msrb.mxu0 %v873_v20  ;;  %1264 = vmatpush.bf16.msrb.mxu2 %v873_v20 }
 0x51e   :  { %886 = vmatpush.bf16.msrb.mxu0 %v872_v17  ;;  %1265 = vmatpush.bf16.msrb.mxu2 %v872_v17 }
 0x522   :  { %887 = vmatpush.bf16.msrb.mxu0 %v871_v14  ;;  %1266 = vmatpush.bf16.msrb.mxu2 %v871_v14 }
 0x526   :  { %888 = vmatpush.bf16.msrb.mxu0 %v870_v43  ;;  %1267 = vmatpush.bf16.msrb.mxu2 %v870_v43 }
 0x529   :  { %894 = vmatmul.bf16.vlgmr.msrb.gmra.mxu2 %v1505_v26  ;;  %889 = vmatmul.bf16.vlgmr.msrb.gmra.mxu0 %v1502_v25 }
 0x539   :  { %899 = vmatmul.bf16.gmra.mxu2 %v1508_v27 }
 0x549   :  { %904 = vmatmul.bf16.gmra.mxu2 %v1511_v28 }
 0x559   :  { %909 = vmatmul.bf16.gmra.mxu2 %v1514_v29 }
 0x569   :  { %914 = vmatmul.bf16.gmra.mxu2 %v1517_v30 }
 0x579   :  { %919 = vmatmul.bf16.gmra.mxu2 %v1520_v35 }
 0x589   :  { %924 = vmatmul.bf16.gmra.mxu2 %v1523_v39 }
 0x5a6   :  { %v890_v18 = vpop.f32.mrf.mxu0 }
 0x5a7   :  { %v891_v24 = vadd.f32 %v1281_v45, %v890_v18 }
 0x5a9   :  { %v930_v32 = vmax.f32 %v891_v24, 0.0 }
 0x5ac   :  { %v895_v44 = vpop.f32.mrf.mxu2 }
 0x5ad   :  { %v896_v26 = vadd.f32 %v1281_v45, %v895_v44 }
 0x5ae   :  { %v892_v23 = vpop.f32.mrf.mxu0 }
 0x5af   :  { %v932_v47 = vmax.f32 %v896_v26, 0.0  ;;  %v893_v31 = vadd.f32 %v1281_v45, %v892_v23 }
 0x5b1   :  { %v931_v11 = vmax.f32 %v893_v31, 0.0 }
 0x5b3   :  { %v946_v33 = vpack.c.bf16 %v931_v11, %v930_v32 }
 0x5b4   :  { %v897_v46 = vpop.f32.mrf.mxu2 }
 0x5b5   :  { %v898_v25 = vadd.f32 %v1281_v45, %v897_v46 }
 0x5b7   :  { %v933_v27 = vmax.f32 %v898_v25, 0.0 }
 0x5b9   :  { %v947_v48 = vpack.c.bf16 %v933_v27, %v932_v47 }
 0x5bc   :  { %v900_v28 = vpop.f32.mrf.mxu2 }
 0x5bd   :  { %v901_v49 = vadd.f32 %v1281_v45, %v900_v28 }
 0x5bf   :  { %v934_v30 = vmax.f32 %v901_v49, 0.0 }
 0x5c4   :  { %v902_v29 = vpop.f32.mrf.mxu2 }
 0x5c5   :  { %v903_v50 = vadd.f32 %v1281_v45, %v902_v29 }
 0x5c7   :  { %v935_v51 = vmax.f32 %v903_v50, 0.0 }
 0x5c9   :  { %v948_v35 = vpack.c.bf16 %v935_v51, %v934_v30 }
 0x5cc   :  { %v905_v52 = vpop.f32.mrf.mxu2 }
 0x5cd   :  { %v906_v39 = vadd.f32 %v1281_v45, %v905_v52 }
 0x5cf   :  { %v936_v55 = vmax.f32 %v906_v39, 0.0 }
 0x5d4   :  { %v907_v53 = vpop.f32.mrf.mxu2 }
 0x5d5   :  { %v908_v54 = vadd.f32 %v1281_v45, %v907_v53 }
 0x5d7   :  { %v937_v56 = vmax.f32 %v908_v54, 0.0 }
 0x5d9   :  { %v949_v57 = vpack.c.bf16 %v937_v56, %v936_v55 }
 0x5dc   :  { %v910_v42 = vpop.f32.mrf.mxu2 }
 0x5dd   :  { %v911_v16 = vadd.f32 %v1281_v45, %v910_v42 }
 0x5df   :  { %v938_v21 = vmax.f32 %v911_v16, 0.0 }
 0x5e4   :  { %v912_v58 = vpop.f32.mrf.mxu2 }
 0x5e5   :  { %v913_v13 = vadd.f32 %v1281_v45, %v912_v58 }
 0x5e7   :  { %v939_v19 = vmax.f32 %v913_v13, 0.0 }
 0x5e9   :  { %v950_v22 = vpack.c.bf16 %v939_v19, %v938_v21 }
 0x5ec   :  { %v915_v59 = vpop.f32.mrf.mxu2 }
 0x5ed   :  { %v916_v10 = vadd.f32 %v1281_v45, %v915_v59 }
 0x5ef   :  { %v940_v17 = vmax.f32 %v916_v10, 0.0 }
 0x5f4   :  { %v917_v60 = vpop.f32.mrf.mxu2 }
 0x5f5   :  { %v918_v7 = vadd.f32 %v1281_v45, %v917_v60 }
 0x5f7   :  { %v941_v14 = vmax.f32 %v918_v7, 0.0 }
 0x5f9   :  { %v951_v20 = vpack.c.bf16 %v941_v14, %v940_v17 }
 0x5fc   :  { %v920_v61 = vpop.f32.mrf.mxu2 }
 0x5fd   :  { %v921_v4 = vadd.f32 %v1281_v45, %v920_v61 }
 0x5ff   :  { %v942_v12 = vmax.f32 %v921_v4, 0.0 }
 0x604   :  { %v922_v62 = vpop.f32.mrf.mxu2 }
 0x605   :  { %v923_v2 = vadd.f32 %v1281_v45, %v922_v62 }
 0x607   :  { %v943_v8 = vmax.f32 %v923_v2, 0.0 }
 0x609   :  { %v952_v15 = vpack.c.bf16 %v943_v8, %v942_v12 }
 0x60c   :  { %v925_v63 = vpop.f32.mrf.mxu2 }
 0x60d   :  { %v926_v0 = vadd.f32 %v1281_v45, %v925_v63 }
 0x60f   :  { %v944_v5 = vmax.f32 %v926_v0, 0.0 }
 0x614   :  { %v927_v1 = vpop.f32.mrf.mxu2 }
 0x615   :  { %v928_v3 = vadd.f32 %v1281_v45, %v927_v1 }
 0x617   :  { %v945_v6 = vmax.f32 %v928_v3, 0.0 }
 0x619   :  { %v953_v9 = vpack.c.bf16 %v945_v6, %v944_v5 }
 0x61b   :  { %962 = vmatpush.bf16.msra.mxu3 %v953_v9 }
 0x61f   :  { %963 = vmatpush.bf16.msra.mxu3 %v952_v15 }
 0x623   :  { %964 = vmatpush.bf16.msra.mxu3 %v951_v20 }
 0x627   :  { %965 = vmatpush.bf16.msra.mxu3 %v950_v22 }
 0x62b   :  { %966 = vmatpush.bf16.msra.mxu3 %v949_v57 }
 0x62f   :  { %967 = vmatpush.bf16.msra.mxu3 %v948_v35 }
 0x633   :  { %968 = vmatpush.bf16.msra.mxu3 %v947_v48 }
 0x637   :  { %969 = vmatpush.bf16.msra.mxu3 %v946_v33 }
 0x63a   :  { %970 = vmatmul.bf16.vlgmr.msra.gmra.mxu3 %v1243_v34 }
 0x6bd   :  { %v971_v36 = vpop.f32.mrf.mxu3 }
 0x6be   :  { %976 = vst [vmem:[#allocation11] sm:$0xff] %v971_v36 }
 0x6c5   :  { %v973_v37 = vpop.f32.mrf.mxu3 }
 0x6c6   :  { %977 = vst [vmem:[#allocation11 + $0x8] sm:$0xff] %v973_v37 }
 0x6c7   :  { %990 = dma.vmem_to_hbm [thread:$0]  %s983_s30, 256, %s985_s10, [#allocation4], %s1442_s11, %s1442_s11, %s1443_s12  }
 0x6c8   :  { %1432 = dma.done.wait [#allocation4], 256  }
 0x6c9   :  { %1433 = vsyncadd [#allocation4], 4294967040 }
 0x6ca   :  { %995 = vsyncpa [#allocation3], 1 }
 0x6cb   :  { %996 = vsyncpa [#allocation6], 1 }
 0x6cc   :  { %997 = vsyncpa [#allocation9], 1 }
 0x6cd   :  { %998 = vsyncpa [#allocation4], 1 }

</bundles_post_ra>
